<compile_context>
chip_gen: v7x
topology: tpu7x:2x2x1
jax: 0.10.0
libtpu: 0.0.40
codegen_flags: <defaults>
</compile_context>

<pallas_src>
from functools import partial

import jax
import jax.numpy as jnp
import numpy as np
from jax.experimental import pallas as pl
from jax.experimental.pallas import tpu as pltpu


def _round_up(x, m):
    return ((x + m - 1) // m) * m


def _tpu_generation_info():
    """(vmem_capacity_bytes, multi_tensorcore) with conservative fallbacks."""
    vmem_cap = 64 << 20                      # v7x-safe default
    try:
        vmem_cap = int(pltpu.get_tpu_info().vmem_capacity_bytes)
    except Exception:
        pass
    multi_tc = False
    try:
        kind = jax.devices()[0].device_kind.lower()
        multi_tc = "7" in kind               # v7x: 2 TensorCores per chip
    except Exception:
        pass
    return vmem_cap, multi_tc


def _pick_tiles(n, kn, in_f_pad, tile_budget, multi_tc):
    """Pick (tx, tkn): node-tile width and contraction-tile length (mult. of 128)."""
    n_x_min = _round_up(n, 128)

    def footprint(tx, tkn):
        return (2 * tx * tkn * 2             # Ak slab tile, double-buffered, bf16
                + 2 * tkn * in_f_pad * 2     # t2 tile, double-buffered, bf16
                + 2 * tx * in_f_pad * 4)     # resident f32 output tile (dbl buf)

    tx_cands = [t for t in (1024, 512, 256, 128) if t <= n_x_min] or [n_x_min]
    if multi_tc:
        # v7x megacore: prefer >=2 x-tiles so both TensorCores get work.
        ge2 = [t for t in tx_cands if _round_up(n, t) // t >= 2]
        if ge2:
            tx_cands = ge2 + [t for t in tx_cands if t not in ge2]

    kn_full = _round_up(kn, 128)
    # First choice: whole contraction resident (one chunk), biggest tx that fits.
    for tx in tx_cands:
        if footprint(tx, kn_full) <= tile_budget:
            return tx, kn_full
    # Otherwise tile the contraction axis (accumulator pattern in the kernel).
    tx = min(512, n_x_min)
    n_c = 2
    while True:
        tkn = _round_up(-(-kn // n_c), 128)
        if footprint(tx, tkn) <= tile_budget or tkn == 128:
            return tx, tkn
        n_c += 1


def _lrp_tagcn_kernel(ak_ref, t2_ref, out_ref):
    # ak_ref:  (TX, TKN)       bf16  contiguous x-major slab tile, slab[x, k*N+i]
    # t2_ref:  (TKN, in_f_pad) bf16  t2[k*N+i, y]
    # out_ref: (TX, in_f_pad)  f32   lane-dense; resident across contraction axis
    @pl.when(pl.program_id(1) == 0)
    def _():
        out_ref[...] = jnp.zeros_like(out_ref)

    # Canonical (M,K)x(K,N) MXU contraction, f32 accumulate in the output block.
    out_ref[...] += jnp.dot(ak_ref[...], t2_ref[...],
                            preferred_element_type=jnp.float32)


@partial(jax.jit, static_argnums=(3,))
def lrp_tagcn(A, W, r, k):
    """LRP (z-rule) for a TAGConv layer.

    A: (N, N)                 float32  normalized adjacency D^-1/2 adj D^-1/2
    W: (out_f, in_f*(K+1))    float32  TAGConv linear weight (layer.lin.weight)
    r: (N, out_f)             float32  relevance of the latter layer
    k: int (static)           number of hops K
    returns (N, in_f) float32 relevance of this layer's input.
    """
    n = A.shape[0]
    out_f = W.shape[0]
    kp1 = k + 1
    in_f = W.shape[1] // kp1

    # rho(Wk)[k] = |W[:, k*in_f:(k+1)*in_f].T|  ->  (K+1, in_f, out_f)
    rhow = jnp.abs(jnp.transpose(W.reshape(out_f, kp1, in_f), (1, 2, 0)))
    rhow = rhow.astype(jnp.float32)

    # ---- generation-aware tile geometry ----------------------------------
    vmem_cap, multi_tc = _tpu_generation_info()
    if vmem_cap >= (100 << 20):              # v5e / v6e: 128 MiB VMEM
        tile_budget, limit_cap = 80 << 20, 100 << 20
    else:                                    # v7x: 64 MiB VMEM, leave headroom
        tile_budget, limit_cap = 36 << 20, 52 << 20

    in_f_pad = _round_up(in_f, 128)          # lane-dense output
    kn = kp1 * n                             # contraction length (k,i) flattened
    tx, tkn = _pick_tiles(n, kn, in_f_pad, tile_budget, multi_tc)
    n_c = max(1, -(-kn // tkn))              # contraction chunks
    kn_pad = n_c * tkn
    n_x = _round_up(n, tx)
    grid = (n_x // tx, n_c)

    f16 = jnp.bfloat16

    # ---- build the x-major bf16 power slab directly in kernel layout ------
    # slab[x, kk*n + i] = A^kk[i, x] = (A^T)^kk[x, i]; built once, no repack.
    # TODO(synk): on v7x an fp8(e4m3)+scale slab would halve the HBM stream
    # again; kept bf16 for cross-generation numerics.
    At = A.astype(jnp.float32).T
    slab = jnp.zeros((n_x, kn_pad), f16)
    row_sums = []
    Bk = jnp.eye(n, dtype=jnp.float32)       # (A^T)^0
    for kk in range(kp1):
        if kk > 0:
            Bk = Bk @ At                     # (A^T)^kk = (A^kk)^T
        slab = slab.at[:n, kk * n:(kk + 1) * n].set(Bk.astype(f16))
        row_sums.append(jnp.sum(Bk, axis=0))     # sum_x A^kk[i, x], shape (n,)
    row_sums = jnp.stack(row_sums)               # (K+1, n)

    # ---- tiny f32 prologue hoisted out of the kernel -----------------------
    col_sums = jnp.sum(rhow, axis=1)                       # (K+1, out_f)
    S = jnp.einsum('ki,kj->ij', row_sums, col_sums)        # == U.sum(dims=(2,3))
    # TODO(synk): literal torch z-rule has no epsilon; S==0 gives inf/NaN
    # exactly as the original module would.
    c = r.astype(jnp.float32) / S                          # (n, out_f), f32
    t2 = jnp.einsum('ij,kyj->kiy', c, rhow)                # (K+1, n, in_f), f32
    t2 = t2.reshape(kp1 * n, in_f)
    t2_pad = jnp.zeros((kn_pad, in_f_pad), f16).at[:kn, :in_f].set(t2.astype(f16))

    # ---- Pallas call -------------------------------------------------------
    vmem_need = (2 * tx * tkn * 2            # Ak double buffer (bf16)
                 + 2 * tkn * in_f_pad * 2    # t2 double buffer (bf16)
                 + 2 * tx * in_f_pad * 4)    # f32 output block (dbl buf)
    vmem_limit = int(min(max(vmem_need + (12 << 20), 32 << 20), limit_cap))

    # TODO(synk): t2 is grid-invariant when n_c == 1; pipeline_mode=pl.Buffered(1)
    # would drop its second VMEM buffer (skipped here for lowering robustness).
    out_pad = pl.pallas_call(
        _lrp_tagcn_kernel,
        out_shape=jax.ShapeDtypeStruct((n_x, in_f_pad), jnp.float32),
        grid=grid,
        in_specs=[
            pl.BlockSpec((tx, tkn), lambda xi, ci: (xi, ci)),
            pl.BlockSpec((tkn, in_f_pad), lambda xi, ci: (ci, 0)),
        ],
        out_specs=pl.BlockSpec((tx, in_f_pad), lambda xi, ci: (xi, 0)),
        compiler_params=pltpu.CompilerParams(
            dimension_semantics=("parallel", "arbitrary"),
            vmem_limit_bytes=vmem_limit),
    )(slab, t2_pad)

    return out_pad[:n, :in_f]


if __name__ == "__main__":
    N, IN_FEATS, OUT_FEATS, K = 8, 16, 8, 2

    key = jax.random.PRNGKey(0)
    k1, k2, k3, k4 = jax.random.split(key, 4)

    # --- synthetic graph (replaces DGL graph.in_degrees() / graph.adj()) ---
    adj_rand = (jax.random.uniform(k1, (N, N)) < 0.4).astype(jnp.float32)
    adj = jnp.clip(adj_rand + adj_rand.T + jnp.eye(N, dtype=jnp.float32), 0.0, 1.0)
    in_deg = jnp.clip(jnp.sum(adj, axis=0), 1.0, None)          # clamp(min=1)
    dm = jnp.diag(in_deg ** -0.5)
    A = dm @ adj @ dm                                           # D^-1/2 A D^-1/2

    # --- TAGConv parameters (bias `b` is unused by the LRP forward) --------
    W = jax.random.normal(k2, (OUT_FEATS, IN_FEATS * (K + 1)), dtype=jnp.float32)

    # --- forward inputs (layer input `a` only contributes len(a)) ----------
    a = jax.random.normal(k3, (N, IN_FEATS), dtype=jnp.float32)
    r = jnp.abs(jax.random.normal(k4, (N, OUT_FEATS), dtype=jnp.float32))

    out = jax.block_until_ready(lrp_tagcn(A, W, r, K))

    # --- pure-JAX f32 reference: literal U-tensor formulation --------------
    Ak = [jnp.eye(N, dtype=jnp.float32)]
    for _ in range(K):
        Ak.append(Ak[-1] @ A)
    ak = jnp.stack(Ak)                                          # (K+1, N, N)
    dW = W.shape[1] // (K + 1)
    rhow_ref = jnp.stack([jnp.abs(W[:, kk * dW:(kk + 1) * dW].T)
                          for kk in range(K + 1)])              # (K+1, in, out)
    U = jnp.einsum('kix,kyj->ijxy', ak, rhow_ref)               # (N, out, N, in)
    S = U.sum(axis=(2, 3))
    ref = jnp.einsum('ijxy,ij->xy', U, r / S)                   # (N, in)

    # bf16 streaming operands with f32 accumulation: relaxed tolerance
    np.testing.assert_allclose(np.asarray(out), np.asarray(ref),
                               rtol=2e-2, atol=1e-3)
    print("KERNEL_OK")
</pallas_src>

<mosaic_0001>
module attributes {stable_mosaic.version = 11 : i64} {
  func.func @_lrp_tagcn_kernel(%arg0: i32, %arg1: i32, %arg2: memref<128x128xbf16, #tpu.memory_space<vmem>>, %arg3: memref<128x128xbf16, #tpu.memory_space<vmem>>, %arg4: memref<128x128xf32, #tpu.memory_space<vmem>>) attributes {dimension_semantics = [#tpu.dimension_semantics<parallel>, #tpu.dimension_semantics<arbitrary>], iteration_bounds = array<i64: 1, 1>, scalar_prefetch = 0 : i64, scratch_operands = 0 : i64, tpu.core_type = #tpu.core_type<tc>, window_params = [{transform_indices = @transform_0, window_bounds = array<i64: 128, 128>}, {transform_indices = @transform_1, window_bounds = array<i64: 128, 128>}, {transform_indices = @transform_2, window_bounds = array<i64: 128, 128>}]} {
    %c0_i32 = arith.constant 0 : i32
    %0 = arith.cmpi eq, %arg1, %c0_i32 : i32
    %1 = arith.extui %0 : i1 to i32
    %c0_i32_0 = arith.constant 0 : i32
    %2 = arith.cmpi ne, %1, %c0_i32_0 : i32
    scf.if %2 {
      %cst_8 = arith.constant 0.000000e+00 : f32
      %9 = vector.broadcast %cst_8 : f32 to vector<128x128xf32>
      %c0_9 = arith.constant 0 : index
      %c0_10 = arith.constant 0 : index
      %10 = vector.load %arg4[%c0_9, %c0_10] : memref<128x128xf32, #tpu.memory_space<vmem>>, vector<128x128xf32>
      tpu.vector_store %arg4[%c0_9, %c0_10], %9 {strides = array<i32>} : memref<128x128xf32, #tpu.memory_space<vmem>>, vector<128x128xf32>,
    } else {
    }
    %c0 = arith.constant 0 : index
    %c0_1 = arith.constant 0 : index
    %3 = vector.load %arg4[%c0, %c0_1] : memref<128x128xf32, #tpu.memory_space<vmem>>, vector<128x128xf32>
    %c0_2 = arith.constant 0 : index
    %c0_3 = arith.constant 0 : index
    %4 = vector.load %arg2[%c0_2, %c0_3] : memref<128x128xbf16, #tpu.memory_space<vmem>>, vector<128x128xbf16>
    %c0_4 = arith.constant 0 : index
    %c0_5 = arith.constant 0 : index
    %5 = vector.load %arg3[%c0_4, %c0_5] : memref<128x128xbf16, #tpu.memory_space<vmem>>, vector<128x128xbf16>
    %cst = arith.constant dense<0.000000e+00> : vector<128x128xf32>
    %6 = tpu.matmul %4, %5, %cst {dimension_numbers = #tpu.dot_dimension_numbers<[1], [0], [0], [1], [0, 0, 1, 1], [], []>} : vector<128x128xbf16>, vector<128x128xbf16>, vector<128x128xf32> -> vector<128x128xf32>
    %7 = arith.addf %3, %6 : vector<128x128xf32>
    %c0_6 = arith.constant 0 : index
    %c0_7 = arith.constant 0 : index
    %8 = vector.load %arg4[%c0_6, %c0_7] : memref<128x128xf32, #tpu.memory_space<vmem>>, vector<128x128xf32>
    tpu.vector_store %arg4[%c0_6, %c0_7], %7 {strides = array<i32>} : memref<128x128xf32, #tpu.memory_space<vmem>>, vector<128x128xf32>,
    return
  }
  func.func @transform_0(%arg0: i32, %arg1: i32) -> (i32, i32) {
    %c0_i32 = arith.constant 0 : i32
    return %arg0, %arg1 : i32, i32
  }
  func.func @transform_1(%arg0: i32, %arg1: i32) -> (i32, i32) {
    %c0_i32 = arith.constant 0 : i32
    %c0_i32_0 = arith.constant 0 : i32
    return %arg1, %c0_i32 : i32, i32
  }
  func.func @transform_2(%arg0: i32, %arg1: i32) -> (i32, i32) {
    %c0_i32 = arith.constant 0 : i32
    %c0_i32_0 = arith.constant 0 : i32
    return %arg0, %c0_i32 : i32, i32
  }
}

</mosaic_0001>

<bundles_post_ra>
// kernel: lrp_tagcn.1
= control target key start
LH: loop header
LB: loop body
LE: loop exit
PB: predicated region body
PF: predicated region fallthrough
CT: control target
= control target key end

     0   :  { %s517_s1 = inlined_call_operand.vmem [shape: bf16[128,128], index: 1, kind: input, shape index: {}]   ;;  %s518_s0 = inlined_call_operand.vmem [shape: bf16[128,128], index: 0, kind: input, shape index: {}]   ;;  %s519_s2 = inlined_call_operand.vmem [shape: f32[128,128], index: 2, kind: output, shape index: {}]  }
   0x1   :  { %v390_v0 = vld [vmem:[%s517_s1] sm:$0xff]   ;;  %v391_v1 = vld [vmem:[%s517_s1 + $0x8] sm:$0xff]   ;;  %v392_v2 = vld [vmem:[%s517_s1 + $0x10] sm:$0xff]  }
   0x2   :  { %341 = vmatprep.subr.bf16.mxu0 %v390_v0  ;;  %373 = vmatprep.subr.bf16.mxu1 %v390_v0  ;;  %v393_v3 = vld [vmem:[%s517_s1 + $0x18] sm:$0xff]   ;;  %v398_v4 = vld [vmem:[%s518_s0] sm:$0xff]   ;;  %v395_v7 = vld [vmem:[%s517_s1 + $0x28] sm:$0xff]  }
   0x3   :  { %342 = vmatpush3.bf16.msra.mxu0 %v390_v0  ;;  %381 = vmatpush3.bf16.msra.mxu1 %v390_v0  ;;  %v399_v5 = vld [vmem:[%s518_s0 + $0x20] sm:$0xff]   ;;  %v396_v8 = vld [vmem:[%s517_s1 + $0x30] sm:$0xff]   ;;  %v397_v9 = vld [vmem:[%s517_s1 + $0x38] sm:$0xff]  }
   0x4   :  { %343 = vmatprep.subr.bf16.mxu0 %v391_v1  ;;  %374 = vmatprep.subr.bf16.mxu1 %v391_v1  ;;  %v394_v6 = vld [vmem:[%s517_s1 + $0x20] sm:$0xff]   ;;  %v400_v10 = vld [vmem:[%s518_s0 + $0x8] sm:$0xff]   ;;  %v402_v12 = vld [vmem:[%s518_s0 + $0x10] sm:$0xff]  }
   0x5   :  { %357 = vmatprep.mubr.bf16.mxu0 %v398_v4  ;;  %365 = vmatprep.mubr.bf16.mxu1 %v399_v5  ;;  %v401_v11 = vld [vmem:[%s518_s0 + $0x28] sm:$0xff]   ;;  %v403_v13 = vld [vmem:[%s518_s0 + $0x30] sm:$0xff]   ;;  %v404_v14 = vld [vmem:[%s518_s0 + $0x18] sm:$0xff]  }
   0x6   :  { %v405_v15 = vld [vmem:[%s518_s0 + $0x38] sm:$0xff]  }
   0x7   :  { %344 = vmatpush3.bf16.msra.mxu0 %v391_v1  ;;  %382 = vmatpush3.bf16.msra.mxu1 %v391_v1 }
   0x8   :  { %345 = vmatprep.subr.bf16.mxu0 %v392_v2  ;;  %375 = vmatprep.subr.bf16.mxu1 %v392_v2 }
   0xb   :  { %346 = vmatpush3.bf16.msra.mxu0 %v392_v2  ;;  %383 = vmatpush3.bf16.msra.mxu1 %v392_v2 }
   0xc   :  { %347 = vmatprep.subr.bf16.mxu0 %v393_v3  ;;  %376 = vmatprep.subr.bf16.mxu1 %v393_v3 }
   0xf   :  { %348 = vmatpush3.bf16.msra.mxu0 %v393_v3  ;;  %384 = vmatpush3.bf16.msra.mxu1 %v393_v3 }
  0x10   :  { %349 = vmatprep.subr.bf16.mxu0 %v394_v6  ;;  %377 = vmatprep.subr.bf16.mxu1 %v394_v6 }
  0x13   :  { %350 = vmatpush3.bf16.msra.mxu0 %v394_v6  ;;  %385 = vmatpush3.bf16.msra.mxu1 %v394_v6 }
  0x14   :  { %351 = vmatprep.subr.bf16.mxu0 %v395_v7  ;;  %378 = vmatprep.subr.bf16.mxu1 %v395_v7 }
  0x17   :  { %352 = vmatpush3.bf16.msra.mxu0 %v395_v7  ;;  %386 = vmatpush3.bf16.msra.mxu1 %v395_v7 }
  0x18   :  { %353 = vmatprep.subr.bf16.mxu0 %v396_v8  ;;  %379 = vmatprep.subr.bf16.mxu1 %v396_v8 }
  0x1b   :  { %354 = vmatpush3.bf16.msra.mxu0 %v396_v8  ;;  %387 = vmatpush3.bf16.msra.mxu1 %v396_v8 }
  0x1c   :  { %355 = vmatprep.subr.bf16.mxu0 %v397_v9  ;;  %380 = vmatprep.subr.bf16.mxu1 %v397_v9 }
  0x1f   :  { %356 = vmatpush3.bf16.msra.mxu0 %v397_v9  ;;  %388 = vmatpush3.bf16.msra.mxu1 %v397_v9 }
  0x22   :  { %358 = vmatmul.mubr.bf16.vlgmr.msra.gmra.mrb[0].mxu0 %v400_v10  ;;  %366 = vmatmul.mubr.bf16.vlgmr.msra.gmra.mrb[0].mxu1 %v401_v11 }
  0x23   :  { %361 = vmatprep.mubr.bf16.mxu0 %v402_v12  ;;  %369 = vmatprep.mubr.bf16.mxu1 %v403_v13 }
  0x2a   :  { %362 = vmatmul.mubr.bf16.gmra.mrb[4].mxu0 %v404_v14  ;;  %370 = vmatmul.mubr.bf16.gmra.mrb[4].mxu1 %v405_v15 }
  0xf5   :  { %v359_v16 = vpop.f32.mrb[0].mxu0  ;;  %v367_v17 = vpop.f32.mrb[0].mxu1 }
  0xf6   :  { %v210_v18 = vpop.f32.mrb[1].mxu0  ;;  %v242_v19 = vpop.f32.mrb[1].mxu1  ;;  %291 = vst [vmem:[%s519_s2 + $0x10] sm:$0xff] %v359_v16  ;;  %299 = vst [vmem:[%s519_s2 + $0x50] sm:$0xff] %v367_v17 }
  0xf7   :  { %v360_v20 = vpop.f32.mrb[2].mxu0  ;;  %v368_v21 = vpop.f32.mrb[2].mxu1  ;;  %289 = vst [vmem:[%s519_s2] sm:$0xff] %v210_v18  ;;  %297 = vst [vmem:[%s519_s2 + $0x40] sm:$0xff] %v242_v19 }
  0xf8   :  { %v213_v22 = vpop.f32.mrb[3].mxu0  ;;  %v245_v23 = vpop.f32.mrb[3].mxu1  ;;  %292 = vst [vmem:[%s519_s2 + $0x18] sm:$0xff] %v360_v20  ;;  %300 = vst [vmem:[%s519_s2 + $0x58] sm:$0xff] %v368_v21 }
  0xf9   :  { %290 = vst [vmem:[%s519_s2 + $0x8] sm:$0xff] %v213_v22  ;;  %298 = vst [vmem:[%s519_s2 + $0x48] sm:$0xff] %v245_v23 }
  0xfd   :  { %v363_v24 = vpop.f32.mrb[4].mxu0  ;;  %v371_v25 = vpop.f32.mrb[4].mxu1 }
  0xfe   :  { %v226_v26 = vpop.f32.mrb[5].mxu0  ;;  %v258_v27 = vpop.f32.mrb[5].mxu1  ;;  %295 = vst [vmem:[%s519_s2 + $0x30] sm:$0xff] %v363_v24  ;;  %303 = vst [vmem:[%s519_s2 + $0x70] sm:$0xff] %v371_v25 }
  0xff   :  { %v364_v28 = vpop.f32.mrb[6].mxu0  ;;  %v372_v29 = vpop.f32.mrb[6].mxu1  ;;  %293 = vst [vmem:[%s519_s2 + $0x20] sm:$0xff] %v226_v26  ;;  %301 = vst [vmem:[%s519_s2 + $0x60] sm:$0xff] %v258_v27 }
 0x100   :  { %v229_v30 = vpop.f32.mrb[7].mxu0  ;;  %v261_v31 = vpop.f32.mrb[7].mxu1  ;;  %296 = vst [vmem:[%s519_s2 + $0x38] sm:$0xff] %v364_v28  ;;  %304 = vst [vmem:[%s519_s2 + $0x78] sm:$0xff] %v372_v29 }
 0x101   :  { %294 = vst [vmem:[%s519_s2 + $0x28] sm:$0xff] %v229_v30  ;;  %302 = vst [vmem:[%s519_s2 + $0x68] sm:$0xff] %v261_v31 }

</bundles_post_ra>
